<compile_context>
chip_gen: v5e
topology: v5e:2x2
jax: 0.10.0
libtpu: 0.0.40
codegen_flags: <defaults>
</compile_context>

<pallas_src>
import jax
import jax.numpy as jnp
from jax.experimental import pallas as pl
from jax.experimental.pallas import tpu as pltpu

_MIB = 1 << 20


# ---------------------------------------------------------------------------
# Kernels
# ---------------------------------------------------------------------------

def _folded_kernel(x_ref, w_ref, b_ref, o_ref):
    """Channel mix + 2x2 pixel shuffle, stored directly in an NCHW-compatible layout.

    x_ref: (Cin, tP)        tP = tR*W flat pixels of tR whole input rows
    w_ref: (4, Cout, Cin)   tap index k = 2*kh + kw (resident in VMEM)
    b_ref: (Cout, 1)        f32 bias (resident)
    o_ref: (Cout, tR, 4W)   o[co, r, kh*2W + 2c + kw] = out[co, 2r+kh, 2c+kw]
    """
    cout, t_r, four_w = o_ref.shape
    two_w = four_w // 2
    x = x_ref[...]
    b = b_ref[...].astype(jnp.float32)
    for kh in range(2):
        a0 = jnp.dot(w_ref[2 * kh], x, preferred_element_type=jnp.float32) + b
        a1 = jnp.dot(w_ref[2 * kh + 1], x, preferred_element_type=jnp.float32) + b
        # In-register lane interleave of the kw=0 / kw=1 taps: one output row
        # (length 2W) per input row; MXU/XLU work hides under the DMA slack.
        rows = jnp.stack([a0, a1], axis=-1).reshape(cout, t_r, two_w)
        # kh=0 rows go to lanes [0, 2W), kh=1 rows to lanes [2W, 4W): contiguous,
        # static, full-lane slices of the output block.
        o_ref[:, :, kh * two_w:(kh + 1) * two_w] = rows.astype(o_ref.dtype)
    # TODO(synk): process the pixel tile in lane chunks (fori_loop) to trim the
    # f32 intermediates / implicit spills for very large tiles.


def _matmul_kernel(x_ref, w_ref, b_ref, o_ref):
    # Fallback kernel: x (Cin, tP), w (Kout, Cin), b (Kout, 1), o (Kout, tP).
    o_ref[...] = (jnp.dot(w_ref[...], x_ref[...], preferred_element_type=jnp.float32)
                  + b_ref[...]).astype(o_ref.dtype)


# ---------------------------------------------------------------------------
# Tiling helpers
# ---------------------------------------------------------------------------

def _vmem_limit(block_bytes, resident_bytes):
    # double-buffered in+out blocks + resident weights/bias + headroom for
    # in-kernel intermediates / Mosaic internal scratch; capped for v7x (64 MiB).
    return int(min(2 * block_bytes + resident_bytes + 32 * _MIB, 64 * _MIB))


def _choose_row_tile(h, w, max_pixels, want_splits):
    """Largest tR dividing H with a layout-friendly block ((tR%8==0 or tR==H)
    and (tR*W%128==0 or tR==H)) and tR*W <= max_pixels.  Prefers >=2 row blocks
    when `want_splits` (v7x megacore with N==1)."""
    divisors = [d for d in range(1, h + 1) if h % d == 0]

    def ok(d):
        return (d % 8 == 0 or d == h) and ((d * w) % 128 == 0 or d == h)

    cands = [d for d in divisors if ok(d) and d * w <= max_pixels]
    if not cands:
        return h  # whole image; caller checks the VMEM budget and may fall back
    t = max(cands)
    if want_splits and (h // t) < 2:
        smaller = [d for d in cands if h // d >= 2]
        if smaller:
            t = max(smaller)
    return t


def _choose_pixel_tile(p, max_pixels, want_splits):
    """Largest lane-friendly (multiple-of-128) flat-pixel tile <= max_pixels.
    Strictly respects the cap; a non-dividing tile leaves a masked tail block."""
    cap = max(128, min(p, max_pixels))
    if p <= cap:
        t = p
    else:
        best = 0
        for cand in range(128, cap + 1, 128):
            if p % cand == 0:
                best = cand
        t = best if best else (cap // 128) * 128
    if want_splits and pl.cdiv(p, t) < 2 and p > 256:
        t = min(p, ((p + 1) // 2 + 127) // 128 * 128)  # ~half image, 128-aligned
    return t


# ---------------------------------------------------------------------------
# Forward paths
# ---------------------------------------------------------------------------

def _forward_folded(x, w4, b2, *, max_pixels_per_tile, vmem_block_budget_bytes):
    n, cin, h, w = x.shape
    _, cout, _ = w4.shape
    itemsize = x.dtype.itemsize
    per_pixel = (cin + 4 * cout) * itemsize                       # in+out block bytes / input pixel
    cap = min(max_pixels_per_tile,
              max(128, vmem_block_budget_bytes // (2 * per_pixel)))
    t_r = _choose_row_tile(h, w, cap, want_splits=(n == 1))
    t_p = t_r * w
    if t_p > 2 * max(cap, 128):
        raise ValueError("no layout-friendly row tile fits the VMEM budget")

    grid = (h // t_r, n)                                          # row-tile axis first (megacore)
    block_bytes = t_p * per_pixel
    resident = w4.size * itemsize + b2.size * 4
    x_flat = x.reshape(n, cin, h * w)                             # free, channel-major view

    y = pl.pallas_call(
        _folded_kernel,
        out_shape=jax.ShapeDtypeStruct((n, cout, h, 4 * w), x.dtype),
        grid_spec=pltpu.PrefetchScalarGridSpec(
            num_scalar_prefetch=0,
            grid=grid,
            in_specs=[
                pl.BlockSpec((None, cin, t_p), lambda r, b: (b, 0, r)),
                pl.BlockSpec((4, cout, cin), lambda r, b: (0, 0, 0)),   # resident
                pl.BlockSpec((cout, 1), lambda r, b: (0, 0)),           # resident
            ],
            out_specs=pl.BlockSpec((None, cout, t_r, 4 * w),
                                   lambda r, b: (b, 0, r, 0)),
        ),
        compiler_params=pltpu.CompilerParams(
            dimension_semantics=("parallel", "parallel"),
            vmem_limit_bytes=_vmem_limit(block_bytes, resident)),
    )(x_flat, w4, b2)

    # FREE reshape (contiguous split/merge only): (N, Cout, H, [kh,2c+kw]) -> NCHW.
    return y.reshape(n, cout, 2 * h, 2 * w)


def _forward_unfolded(x, w4, b2, *, max_pixels_per_tile, vmem_block_budget_bytes):
    n, cin, h, w = x.shape
    _, cout, _ = w4.shape
    kout = 4 * cout
    p = h * w
    itemsize = x.dtype.itemsize
    per_pixel = (cin + kout) * itemsize
    cap = min(max_pixels_per_tile,
              max(128, vmem_block_budget_bytes // (2 * per_pixel)))
    t_p = _choose_pixel_tile(p, cap, want_splits=(n == 1))
    grid = (pl.cdiv(p, t_p), n)                                   # pixel-tile axis first

    w2 = w4.reshape(kout, cin)                                    # rows ordered (k, co)
    b_k = jnp.tile(b2, (4, 1))                                    # (Kout, 1) f32
    x_flat = x.reshape(n, cin, p)
    block_bytes = t_p * per_pixel
    resident = w2.size * itemsize + b_k.size * 4

    y = pl.pallas_call(
        _matmul_kernel,
        out_shape=jax.ShapeDtypeStruct((n, kout, p), x.dtype),
        grid_spec=pltpu.PrefetchScalarGridSpec(
            num_scalar_prefetch=0,
            grid=grid,
            in_specs=[
                pl.BlockSpec((None, cin, t_p), lambda q, b: (b, 0, q)),
                pl.BlockSpec((kout, cin), lambda q, b: (0, 0)),
                pl.BlockSpec((kout, 1), lambda q, b: (0, 0)),
            ],
            out_specs=pl.BlockSpec((None, kout, t_p), lambda q, b: (b, 0, q)),
        ),
        compiler_params=pltpu.CompilerParams(
            dimension_semantics=("parallel", "parallel"),
            vmem_limit_bytes=_vmem_limit(block_bytes, resident)),
    )(x_flat, w2, b_k)

    # Single fused XLA permutation pass (pixel shuffle + channel reorder).
    y = y.reshape(n, 2, 2, cout, h, w)
    y = jnp.transpose(y, (0, 3, 4, 1, 5, 2))
    return y.reshape(n, cout, 2 * h, 2 * w)


# ---------------------------------------------------------------------------
# Public wrapper
# ---------------------------------------------------------------------------

_FOLD_DECISION = {}   # (shape/dtype signature) -> use folded kernel?


def segmentation_head_forward(x_nchw, weight, bias, *,
                              max_pixels_per_tile=32768,
                              vmem_block_budget_bytes=16 * _MIB,
                              fold_shuffle=True):
    """ConvTranspose2d(16, num_classes, 2, stride=2) forward.  NCHW in / NCHW out.

    x_nchw: (N, 16, H, W);  weight: (16, num_classes, 2, 2);  bias: (num_classes,)
    returns (N, num_classes, 2H, 2W)
    """
    n, cin, h, w = x_nchw.shape
    cin_w, cout, k_h, k_w = weight.shape
    assert cin == cin_w and k_h == 2 and k_w == 2

    # Tap-major packed weights (k = 2*kh + kw), matched to the activation dtype;
    # bias stays f32 (in-kernel accumulation and bias add are f32).
    w4 = jnp.transpose(weight, (2, 3, 1, 0)).reshape(4, cout, cin).astype(x_nchw.dtype)
    b2 = bias.reshape(cout, 1).astype(jnp.float32)
    kwargs = dict(max_pixels_per_tile=max_pixels_per_tile,
                  vmem_block_budget_bytes=vmem_block_budget_bytes)

    if fold_shuffle:
        key = (n, cin, h, w, cout, str(x_nchw.dtype))
        decision = _FOLD_DECISION.get(key)
        if decision is None:
            # One-time-per-shape probe: compile+run the folded kernel and verify
            # against the proven unfolded path; cache the decision.  (Under an
            # outer jit the probe cannot run concretely and we fall back.)
            ref_out = _forward_unfolded(x_nchw, w4, b2, **kwargs)
            ok, out = False, None
            try:
                out = jax.block_until_ready(_forward_folded(x_nchw, w4, b2, **kwargs))
                ok = bool(jnp.allclose(out, ref_out, rtol=1e-4, atol=1e-4))
            except Exception:
                ok = False
            _FOLD_DECISION[key] = ok
            return out if ok else ref_out
        if decision:
            return _forward_folded(x_nchw, w4, b2, **kwargs)
    return _forward_unfolded(x_nchw, w4, b2, **kwargs)


# ---------------------------------------------------------------------------
# Reference + test
# ---------------------------------------------------------------------------

def _reference_forward(x_nchw, weight, bias):
    """Pure-JAX reference of ConvTranspose2d(k=2, s=2) for verification."""
    n, cin, h, w = x_nchw.shape
    _, cout, k_h, k_w = weight.shape
    out = jnp.zeros((n, cout, h * 2, w * 2), dtype=jnp.float32)
    for kh in range(k_h):
        for kw in range(k_w):
            contrib = jnp.einsum("nchw,co->nohw", x_nchw, weight[:, :, kh, kw])
            out = out.at[:, :, kh::2, kw::2].set(contrib)
    return out + bias[None, :, None, None]


if __name__ == "__main__":
    num_classes = 4
    N, Cin, H, W = 2, 16, 16, 16   # module implies Cin = 16 input channels

    key = jax.random.PRNGKey(0)
    kx, kwt, kb = jax.random.split(key, 3)
    x = jax.random.normal(kx, (N, Cin, H, W), dtype=jnp.float32)
    weight = jax.random.normal(kwt, (Cin, num_classes, 2, 2), dtype=jnp.float32) * 0.1
    bias = jax.random.normal(kb, (num_classes,), dtype=jnp.float32) * 0.1

    out = segmentation_head_forward(x, weight, bias)
    out = jax.block_until_ready(out)

    assert out.shape == (N, num_classes, 2 * H, 2 * W), out.shape

    ref = _reference_forward(x, weight, bias)
    assert jnp.allclose(out, ref, atol=1e-5, rtol=1e-5), "mismatch vs reference"

    print("KERNEL_OK")
</pallas_src>

<mosaic_0001>
module attributes {stable_mosaic.version = 11 : i64} {
  func.func @_matmul_kernel(%arg0: i32, %arg1: i32, %arg2: memref<1x16x256xf32, #tpu.memory_space<vmem>>, %arg3: memref<16x16xf32, #tpu.memory_space<vmem>>, %arg4: memref<16x1xf32, #tpu.memory_space<vmem>>, %arg5: memref<1x16x256xf32, #tpu.memory_space<vmem>>) attributes {dimension_semantics = [#tpu.dimension_semantics<parallel>, #tpu.dimension_semantics<parallel>], iteration_bounds = array<i64: 1, 2>, scalar_prefetch = 0 : i64, scratch_operands = 0 : i64, tpu.core_type = #tpu.core_type<tc>, window_params = [{transform_indices = @transform_0, window_bounds = array<i64: 1, 16, 256>}, {pipeline_mode = #tpu.pipeline_mode<synchronous>, transform_indices = @transform_1, window_bounds = array<i64: 16, 16>}, {pipeline_mode = #tpu.pipeline_mode<synchronous>, transform_indices = @transform_2, window_bounds = array<i64: 16, 1>}, {transform_indices = @transform_3, window_bounds = array<i64: 1, 16, 256>}]} {
    %c0 = arith.constant 0 : index
    %c0_0 = arith.constant 0 : index
    %0 = vector.load %arg3[%c0, %c0_0] : memref<16x16xf32, #tpu.memory_space<vmem>>, vector<16x16xf32>
    %c0_1 = arith.constant 0 : index
    %c0_2 = arith.constant 0 : index
    %c0_3 = arith.constant 0 : index
    %1 = vector.load %arg2[%c0_1, %c0_2, %c0_3] : memref<1x16x256xf32, #tpu.memory_space<vmem>>, vector<1x16x256xf32>
    %2 = vector.shape_cast %1 : vector<1x16x256xf32> to vector<16x256xf32>
    %cst = arith.constant dense<0.000000e+00> : vector<16x256xf32>
    %3 = tpu.matmul %0, %2, %cst {dimension_numbers = #tpu.dot_dimension_numbers<[1], [0], [0], [1], [0, 0, 1, 1], [], []>} : vector<16x16xf32>, vector<16x256xf32>, vector<16x256xf32> -> vector<16x256xf32>
    %c0_4 = arith.constant 0 : index
    %c0_5 = arith.constant 0 : index
    %4 = vector.load %arg4[%c0_4, %c0_5] : memref<16x1xf32, #tpu.memory_space<vmem>>, vector<16x1xf32>
    %5 = vector.broadcast %4 : vector<16x1xf32> to vector<16x256xf32>
    %6 = arith.addf %3, %5 : vector<16x256xf32>
    %c0_6 = arith.constant 0 : index
    %c0_7 = arith.constant 0 : index
    %c0_8 = arith.constant 0 : index
    %7 = vector.load %arg5[%c0_6, %c0_7, %c0_8] : memref<1x16x256xf32, #tpu.memory_space<vmem>>, vector<1x16x256xf32>
    %8 = vector.shape_cast %7 : vector<1x16x256xf32> to vector<16x256xf32>
    %9 = vector.shape_cast %6 : vector<16x256xf32> to vector<1x16x256xf32>
    tpu.vector_store %arg5[%c0_6, %c0_7, %c0_8], %9 {strides = array<i32>} : memref<1x16x256xf32, #tpu.memory_space<vmem>>, vector<1x16x256xf32>,
    return
  }
  func.func @transform_0(%arg0: i32, %arg1: i32) -> (i32, i32, i32) {
    %c0_i32 = arith.constant 0 : i32
    %c0_i32_0 = arith.constant 0 : i32
    return %arg1, %c0_i32, %arg0 : i32, i32, i32
  }
  func.func @transform_1(%arg0: i32, %arg1: i32) -> (i32, i32) {
    %c0_i32 = arith.constant 0 : i32
    %c0_i32_0 = arith.constant 0 : i32
    %c0_i32_1 = arith.constant 0 : i32
    return %c0_i32, %c0_i32_0 : i32, i32
  }
  func.func @transform_2(%arg0: i32, %arg1: i32) -> (i32, i32) {
    %c0_i32 = arith.constant 0 : i32
    %c0_i32_0 = arith.constant 0 : i32
    %c0_i32_1 = arith.constant 0 : i32
    return %c0_i32, %c0_i32_0 : i32, i32
  }
  func.func @transform_3(%arg0: i32, %arg1: i32) -> (i32, i32, i32) {
    %c0_i32 = arith.constant 0 : i32
    %c0_i32_0 = arith.constant 0 : i32
    return %arg1, %c0_i32, %arg0 : i32, i32, i32
  }
}

</mosaic_0001>

<bundles_post_ra>
// kernel: tpu_custom_call.1
= control target key start
LH: loop header
LB: loop body
LE: loop exit
PB: predicated region body
PF: predicated region fallthrough
CT: control target
= control target key end

     0   :  { %8 = vsyncpa [#allocation3], 0  ;;  %s759_s0 = inlined_call_operand.hbm [shape: f32[2,16,256], index: 0, kind: input, shape index: {}]   ;;  %s760_s1 = inlined_call_operand.vmem [shape: f32[16,16], index: 1, kind: input, shape index: {}]   ;;  %s761_s2 = inlined_call_operand.vmem [shape: f32[16,1], index: 2, kind: input, shape index: {}]   ;;  %s762_s3 = inlined_call_operand.hbm [shape: f32[2,16,256], index: 3, kind: output, shape index: {}]  }
   0x1   :  { %10 = vsyncpa [#allocation3 + $0x1], 0 }
   0x2   :  { %11 = vsyncpa [#allocation4], 0 }
   0x3   :  { %13 = vsyncpa [#allocation4 + $0x1], 0  ;;  %s623_s12 = smov 0   ;;  %s625_s13 = smov 0  }
   0x4   :  { %s627_s14 = smov 0   ;;  %s629_s15 = smov 0  }
   0x5   :  { %s631_s16 = smov 0   ;;  %s633_s17 = smov 0  }
   0x6 LB: > { %s391_s18 = sadd.s32 4294967295, %s596_s17   ;;  %s392_s19 = sadd.s32 4294967294, %s596_s17   ;;  %s596_s17 = sphi %s633_s17, %s19_s17   ;;  %s592_s16 = sphi %s631_s16, %s771_s16   ;;  %s588_s15 = sphi %s629_s15, %s770_s15   ;;  %s584_s14 = sphi %s627_s14, %s769_s14   ;;  %s580_s13 = sphi %s625_s13, %s768_s13   ;;  %s576_s12 = sphi %s623_s12, %s767_s12  }
   0x7   : > { %s28_s20 = sadd.s32 1, %s592_s16  ;;  %s40_s21 = sadd.s32 1, %s584_s14 }
   0x8   : > { %p29_p0 = scmp.ge.s32.totalorder %s28_s20, 2  ;;  %p47_p1 = scmp.ne.s32.totalorder %s584_s14, %s580_s13 }
   0x9   : > { %p48_p2 = scmp.eq.s32.totalorder %s596_s17, 0  ;;  %p53_p3 = scmp.ne.s32.totalorder %s580_s13, %s576_s12 }
   0xa   : > { %s773_s20 = smov (%p29_p0, %s28_s20), 0  ;;  %p54_p5 = scmp.eq.s32.totalorder %s391_s18, 0 }
   0xb   : > { %p664_p4 = por %p48_p2, %p47_p1  ;;  %s35_s23 = ssub.s32 %s592_s16, %s773_s20 }
   0xc   : > { %p121_p6 = scmp.eq.s32.totalorder %s391_s18, 1  ;;  %p38_p7 = scmp.eq.s32.totalorder %s35_s23, 0 }
   0xd   : > { %p670_p8 = por %p54_p5, %p53_p3  ;;  %p127_p10 = scmp.eq.s32.totalorder %s392_s19, 1 }
   0xe   : > { %p674_p9 = por %p121_p6, %p47_p1  ;;  %p394_p12 = scmp.ge.s32.totalorder %s596_s17, 2 }
   0xf   : > { %s679_s26 = scalar_select %p38_p7, %s584_s14, %s40_s21  }
  0x10   : > { %p681_p11 = por %p127_p10, %p53_p3  ;;  %p428_p13 = scmp.lt.s32.totalorder %s596_s17, 2 }
  0x11   : > { %s153_s28 = sand.u32 1, %s584_s14   ;;  %s410_s30 = sshll.u32 %s592_s16, 5 }
  0x12   : > { %s395_s29 = sshll.u32 %s153_s28, 5  ;;  %s164_s6 = scalar_lea.hbm %s759_s0, %s410_s30 }
  0x13   : > { %s157_s7 = scalar_lea.vmem [#allocation2], %s395_s29  ;;  %s165_s9 = sshll.u32 %s164_s6, 4  ;;  %s166_s9 = int_to_ptr.hbm [resolvable:$true] %s165_s9 }
  0x14   : > { %s167_s8 = sshll.u32 %s157_s7, 4  ;;  %p421_p0 = pnand %p428_p13, %p664_p4  ;;  %s168_s8 = int_to_ptr.vmem [resolvable:$true] %s167_s8 }
  0x15   : > { %p398_p1 = scmp.ge.s32.totalorder %s596_s17, 1  ;;  %s154_s10 = scalar_lea.sflag [#allocation3], %s153_s28 }
  0x16   : > { %s598_s11 = smov 256   ;;  %s599_s18 = smov 16  }
  0x17   : > { %423 = dma.hbm_to_vmem [thread:$0]  (!%p421_p0), %s166_s9, 512, %s168_s8, %s154_s10, %s598_s11, %s598_s11, %s599_s18  }
  0x18   : > { %p175_p2 = scmp.lt.s32.totalorder %s596_s17, 3 }
  0x1a   : > { %p176_p3 = pnand %p398_p1, %p175_p2 }
  0x1b   : > { %s697_s19 = sand.u32 (!%p176_p3), 1, %s580_s13  }
  0x1c   : > { %179 = sbr.rel (%p176_p3) target bundleno = 179 (0xb3), region = 32  ;;  %s399_s21 = sshll.u32 (!%p176_p3), %s697_s19, 5 }
  0x1d   : > { %s182_s23 = scalar_lea.sflag (!%p176_p3), [#allocation3], %s697_s19  ;;  %s185_s22 = scalar_lea.vmem (!%p176_p3), [#allocation2], %s399_s21 }
  0x21   : > { %567 = dma.done.wait (%p670_p8), %s182_s23, 512  }
  0x22   : > { %569 = vsyncadd (%p670_p8), %s182_s23, 4294966784  ;;  %v600_v0 = vmov 0   ;;  %v215_v1 = vld [vmem:[%s185_s22 + $0x10] sm:$0xff]  ;;  %v216_v2 = vld [vmem:[%s185_s22 + $0x18] sm:$0xff]  ;;  %vm229_vm0 = vcmask 130048   ;;  %s411_s8 = sshll.u32 %s588_s15, 5 }
  0x23   : > { %483 = vset.pattern.permute.xlu0 %v600_v0  ;;  %v213_v3 = vld [vmem:[%s185_s22] sm:$0xff]  ;;  %250 = vmatpush.msra.mxu0 %v215_v1  ;;  %v214_v4 = vld [vmem:[%s185_s22 + $0x8] sm:$0xff]  ;;  %s300_s11 = scalar_lea.hbm %s762_s3, %s411_s8  ;;  %s208_s18 = scalar_lea.vmem [#allocation5], %s399_s21 }
  0x24   : > { %412 = vmatpush.msra.mxu2 %v215_v1  ;;  %273 = vmatpush.msra.mxu1 %v216_v2  ;;  %v211_v5 = vld [vmem:[%s760_s1] sm:$0xff]  ;;  %v212_v6 = vld [vmem:[%s760_s1 + $0x8] sm:$0xff]  ;;  %s301_s23 = sshll.u32 %s208_s18, 4  ;;  %s303_s22 = sshll.u32 %s300_s11, 4  ;;  %s302_s23 = int_to_ptr.vmem [resolvable:$true] %s301_s23  ;;  %s304_s22 = int_to_ptr.hbm [resolvable:$true] %s303_s22 }
  0x25   : > { %414 = vmatpush.msra.mxu3 %v216_v2  ;;  %251 = vmatpush.msra.mxu0 %v213_v3  ;;  %v217_v7 = vld [vmem:[%s761_s2] sm:$0xff]  ;;  %v218_v8 = vld [vmem:[%s761_s2 + $0x8] sm:$0xff]  ;;  %s287_s15 = scalar_lea.sflag [#allocation4], %s697_s19  ;;  %s528_s28 = sshra.s32 %s304_s22, 4  ;;  %s529_s28 = int_to_ptr.hbm [resolvable:$true] %s528_s28 }
  0x26   : > { %413 = vmatpush.msra.mxu2 %v213_v3  ;;  %274 = vmatpush.msra.mxu1 %v214_v4  ;;  %s530_s29 = scalar_lea.hbm %s529_s28, 32  ;;  %s534_s4 = scalar_lea.hbm %s762_s3, 64 }
  0x27   : > { %415 = vmatpush.msra.mxu3 %v214_v4  ;;  %401 = vmatmul.msk.f32.vlgmr.msra.gmra.mxu0 %vm229_vm0, %v211_v5  ;;  %p531_p4 = scmp.ne.s32.totalorder %s529_s28, %s530_s29  ;;  %p535_p7 = scmp.lt.s32.totalorder %s529_s28, %s762_s3 }
  0x28   : > { %402 = vmatmul.msk.f32.vlgmr.msra.gmra.mxu2 %vm229_vm0, %v212_v6  ;;  %403 = vmatmul.msk.f32.vlgmr.msra.gmra.mxu1 %vm229_vm0, %v211_v5  ;;  %p536_p8 = scmp.lt.s32.totalorder %s534_s4, %s530_s29 }
  0x29   : > { %404 = vmatmul.msk.f32.vlgmr.msra.gmra.mxu3 %vm229_vm0, %v212_v6  ;;  %221 = vperm.xlu0 %483, %v217_v7   ;;  %p532_p5 = pnand %p531_p4, %p674_p9 }
  0x2a   : > { %p537_p10 = por %p536_p8, %p535_p7 }
  0x2b   : > { %p533_p6 = pneg %p532_p5 }
  0x2d   : > { %p538_p13 = pnand %p537_p10, %p533_p6 }
  0x31   : > { %226 = vperm.xlu0 %483, %v218_v8  }
  0x9b   : > { %v222_v9 = vpop.permute.xlu0 %221 }
  0xa3   : > { %v227_v14 = vpop.permute.xlu0 %226 }
  0xa4   : > { %v253_v10 = vpop.f32.mrf.mxu0 }
  0xa5   : > { %v254_v11 = vadd.f32 %v253_v10, %v222_v9  ;;  %v276_v12 = vpop.f32.mrf.mxu1 }
  0xa6   : > { %v277_v13 = vadd.f32 %v276_v12, %v222_v9 }
  0xa7   : > { %282 = vst [vmem:[%s208_s18] sm:$0xff] %v254_v11 }
  0xa8   : > { %283 = vst [vmem:[%s208_s18 + $0x8] sm:$0xff] %v277_v13 }
  0xab   : > { %v256_v15 = vpop.f32.mrf.mxu2 }
  0xac   : > { %v257_v16 = vadd.f32 %v256_v15, %v227_v14  ;;  %v279_v17 = vpop.f32.mrf.mxu3 }
  0xad   : > { %v280_v18 = vadd.f32 %v279_v17, %v227_v14 }
  0xae   : > { %284 = vst [vmem:[%s208_s18 + $0x10] sm:$0xff] %v257_v16 }
  0xaf   : > { %285 = vst [vmem:[%s208_s18 + $0x18] sm:$0xff] %v280_v18 }
  0xb0   : > { %541 = shalt.err (!%p538_p13)
}
  0xb1   : > { %s601_s19 = smov 256   ;;  %s602_s6 = smov 16  }
  0xb2   : > { %418 = dma.vmem_to_hbm [thread:$0]  (%p674_p9), %s302_s23, 512, %s304_s22, %s287_s15, %s601_s19, %s601_s19, %s602_s6  }
  0xb3 PF: > { %s318_s7 = sand.u32 1, %s576_s12   ;;  %p425_p0 = pnand %p394_p12, %p681_p11 }
  0xb4   : > { %s319_s8 = scalar_lea.sflag [#allocation4], %s318_s7 }
  0xb5   : > { %p426_p1 = pneg %p425_p0 }
  0xb7   : > { %571 = dma.done.wait (%p426_p1), %s319_s8, 512  }
  0xb8   : > { %573 = vsyncadd (%p426_p1), %s319_s8, 4294966784  ;;  %s19_s17 = sadd.s32 1, %s596_s17   ;;  %s767_s12 = smov %s580_s13 }
  0xb9   : > { %p16_p2 = scmp.ge.s32.totalorder %s19_s17, 4   ;;  %s768_s13 = smov %s584_s14 }
  0xba   : > { %s769_s14 = smov %s679_s26  ;;  %s770_s15 = smov %s592_s16 }
  0xbb   : > { %s771_s16 = smov %s773_s20  ;;  %18 = sbr.rel (!%p16_p2) target bundleno = 6 (0x6), region = 77 }
  0xc0   :  { %325 = vsyncpa [#allocation3], 1 }
  0xc1   :  { %327 = vsyncpa [#allocation3 + $0x1], 1 }
  0xc2   :  { %328 = vsyncpa [#allocation4], 1 }
  0xc3   :  { %330 = vsyncpa [#allocation4 + $0x1], 1 }

</bundles_post_ra>
